<compile_context>
chip_gen: v5e
topology: v5e:2x2
jax: 0.10.0
libtpu: 0.0.40
codegen_flags: <defaults>
</compile_context>

<pallas_src>
import functools

import jax
import jax.numpy as jnp
from jax.experimental import pallas as pl
from jax.experimental.pallas import tpu as pltpu


# ----------------------------- kernels ------------------------------------- #

def _siglu_split_kernel(a_ref, b_ref, o_ref, *, compute_dtype):
    # a_ref, b_ref: (tm, h) lane-aligned halves; o_ref: (tm, h)
    a = a_ref[...].astype(compute_dtype)
    b = b_ref[...].astype(compute_dtype)
    o_ref[...] = (a * (b * jax.nn.sigmoid(b))).astype(o_ref.dtype)


def _siglu_fused_kernel(x_ref, o_ref, *, compute_dtype):
    # x_ref: (tm, d) full-width tile; o_ref: (tm, d // 2)
    h = x_ref.shape[-1] // 2
    a = x_ref[:, :h].astype(compute_dtype)
    b = x_ref[:, h:].astype(compute_dtype)
    o_ref[...] = (a * (b * jax.nn.sigmoid(b))).astype(o_ref.dtype)


# --------------------------- chip / tiling heuristics ----------------------- #

def _chip_info():
    """Best-effort generation detection (safe defaults if query fails)."""
    kind = ""
    try:
        kind = jax.devices()[0].device_kind.lower()
    except Exception:
        pass
    is_v5 = "v5" in kind          # v5e: no bf16 VPU/EUP -> keep f32 compute
    is_v7 = "v7" in kind          # v7x: 64 MiB VMEM/TC, 2 TensorCores/chip
    return is_v5, is_v7


def _round_up(x, m):
    return ((x + m - 1) // m) * m


def _choose_tm(m, d, dtype_bytes, target_tile_bytes, two_tc):
    """Row-tile size: target ~target_tile_bytes of input per step, >=4 blocks
    for non-tiny arrays, even grid length on 2-TC chips, sublane-aligned."""
    mult = max(8, 32 // max(1, dtype_bytes))   # f32 -> 8, bf16 -> 16, int8 -> 32
    row_bytes = d * dtype_bytes
    total_bytes = m * row_bytes

    # Tiny arrays: a single full-extent block; per-step overhead dominates anyway.
    if total_bytes <= (4 << 20) or m <= mult:
        return m

    # Target block count from bytes; never a single block (keep DMA/compute
    # overlap and megacore sharding alive) -> at least 4 blocks.
    nblocks = max(4, pl.cdiv(total_bytes, target_tile_bytes))
    nblocks = min(nblocks, pl.cdiv(m, mult))
    if two_tc and nblocks % 2:
        nblocks += 1
    nblocks = max(1, min(nblocks, pl.cdiv(m, mult)))

    tm = _round_up(pl.cdiv(m, nblocks), mult)
    if two_tc:
        # Rounding tm can change the realized block count; nudge toward even.
        for cand in (tm, tm - mult, tm + mult):
            if cand >= mult and pl.cdiv(m, cand) % 2 == 0:
                tm = cand
                break
    return max(mult, min(tm, m))


# ------------------------------- wrapper ------------------------------------ #

def siglu(x):
    """x: (..., D) with D even -> (..., D // 2), matching the PyTorch module."""
    orig_shape = x.shape
    d = orig_shape[-1]
    assert d % 2 == 0, "last dim must be even"
    h = d // 2

    # Flatten leading dims to a row axis (glue, free reshape).
    m = 1
    for s in orig_shape[:-1]:
        m *= s
    x2 = x.reshape(m, d)

    is_v5, is_v7 = _chip_info()
    dtype_bytes = jnp.dtype(x.dtype).itemsize

    # Generation-specific budgets.
    target_tile_bytes = (8 << 20) if is_v7 else (16 << 20)
    vmem_cap = (48 << 20) if is_v7 else (64 << 20)
    # bf16 math is native on v6e/v7x; v5e keeps the f32 upcast path.
    if x.dtype == jnp.bfloat16 and not is_v5:
        compute_dtype = jnp.bfloat16
    else:
        compute_dtype = jnp.float32

    tm = _choose_tm(m, d, dtype_bytes, target_tile_bytes, two_tc=is_v7)
    grid = (pl.cdiv(m, tm),)  # trailing partial block is masked by Pallas

    # Double-buffered footprint: 2 * (input tile(s) + output tile) ~= 3*tm*d bytes.
    vmem_bytes = int(3 * tm * d * dtype_bytes * 1.25) + (2 << 20)
    vmem_bytes = max(16 << 20, min(vmem_bytes, vmem_cap))

    cparams = pltpu.CompilerParams(
        dimension_semantics=("parallel",),
        vmem_limit_bytes=vmem_bytes,
    )
    cost = pl.CostEstimate(
        flops=3 * m * h,
        transcendentals=m * h,
        bytes_accessed=m * (d + h) * dtype_bytes,
    )

    # Split-BlockSpec path only when halves are lane-aligned AND the per-row
    # contiguous DMA run is long enough (>= 1 KiB) for good HBM burst
    # efficiency; otherwise one contiguous full-width DMA + in-kernel slices.
    use_split = (h % 128 == 0) and (h * dtype_bytes >= 1024)

    if use_split:
        out2 = pl.pallas_call(
            functools.partial(_siglu_split_kernel, compute_dtype=compute_dtype),
            out_shape=jax.ShapeDtypeStruct((m, h), x.dtype),
            grid=grid,
            in_specs=[
                pl.BlockSpec((tm, h), lambda i: (i, 0)),  # a-half
                pl.BlockSpec((tm, h), lambda i: (i, 1)),  # b-half
            ],
            out_specs=pl.BlockSpec((tm, h), lambda i: (i, 0)),
            compiler_params=cparams,
            cost_estimate=cost,
        )(x2, x2)
    else:
        # Lane-aligned (h % 128 == 0) narrow case: slices are relayout-free and
        # output is lane-dense.  Non-aligned h is a rare correctness fallback.
        # TODO(synk): for h % 128 != 0, pad the output width to a multiple of
        # 128 (unmasked vst) if this path ever shows up in profiles.
        out2 = pl.pallas_call(
            functools.partial(_siglu_fused_kernel, compute_dtype=compute_dtype),
            out_shape=jax.ShapeDtypeStruct((m, h), x.dtype),
            grid=grid,
            in_specs=[pl.BlockSpec((tm, d), lambda i: (i, 0))],
            out_specs=pl.BlockSpec((tm, h), lambda i: (i, 0)),
            compiler_params=cparams,
            cost_estimate=cost,
        )(x2)

    return out2.reshape(*orig_shape[:-1], h)


# ------------------------------ reference ----------------------------------- #

def _siglu_ref(x):
    h = x.shape[-1] // 2
    a, b = x[..., :h], x[..., h:]
    return a * (b * jax.nn.sigmoid(b))


if __name__ == "__main__":
    key = jax.random.PRNGKey(0)
    k1, k2, k3, k4 = jax.random.split(key, 4)

    # Small shapes consistent with the module (gating along the last dim).
    x1 = jax.random.normal(k1, (2, 8, 64), dtype=jnp.float32)      # h=32  -> fused (narrow)
    x2 = jax.random.normal(k2, (2, 8, 256), dtype=jnp.float32)     # h=128 -> fused (narrow, lane-aligned)
    x3 = jax.random.normal(k3, (3, 7, 256), dtype=jnp.bfloat16)    # bf16 + ragged row count
    x4 = jax.random.normal(k4, (32, 64, 2048), dtype=jnp.bfloat16) # h=1024 -> split path, multi-block grid

    for x in (x1, x2, x3, x4):
        out = siglu(x)
        jax.block_until_ready(out)
        ref = _siglu_ref(x.astype(jnp.float32))
        assert out.shape == x.shape[:-1] + (x.shape[-1] // 2,), out.shape
        tol = 1e-5 if x.dtype == jnp.float32 else 2e-2
        assert jnp.allclose(out.astype(jnp.float32), ref, atol=tol, rtol=tol), \
            f"mismatch vs reference for shape {x.shape} dtype {x.dtype}"

    print("KERNEL_OK")
</pallas_src>

<mosaic_0001>
module attributes {stable_mosaic.version = 11 : i64} {
  func.func @_siglu_fused_kernel(%arg0: i32, %arg1: memref<16x64xf32, #tpu.memory_space<vmem>>, %arg2: memref<16x32xf32, #tpu.memory_space<vmem>>) attributes {dimension_semantics = [#tpu.dimension_semantics<parallel>], iteration_bounds = array<i64: 1>, scalar_prefetch = 0 : i64, scratch_operands = 0 : i64, tpu.core_type = #tpu.core_type<tc>, window_params = [{transform_indices = @transform_0, window_bounds = array<i64: 16, 64>}, {transform_indices = @transform_1, window_bounds = array<i64: 16, 32>}]} {
    %c0 = arith.constant 0 : index
    %c0_0 = arith.constant 0 : index
    %0 = vector.load %arg1[%c0, %c0_0] : memref<16x64xf32, #tpu.memory_space<vmem>>, vector<16x32xf32>
    %c0_1 = arith.constant 0 : index
    %c32 = arith.constant 32 : index
    %1 = vector.load %arg1[%c0_1, %c32] : memref<16x64xf32, #tpu.memory_space<vmem>>, vector<16x32xf32>
    %2 = arith.negf %1 : vector<16x32xf32>
    %3 = math.exp %2 : vector<16x32xf32>
    %cst = arith.constant 1.000000e+00 : f32
    %4 = vector.broadcast %cst : f32 to vector<16x32xf32>
    %5 = arith.addf %4, %3 : vector<16x32xf32>
    %6 = arith.divf %4, %5 : vector<16x32xf32>
    %7 = arith.mulf %1, %6 : vector<16x32xf32>
    %8 = arith.mulf %0, %7 : vector<16x32xf32>
    %c0_2 = arith.constant 0 : index
    %c0_3 = arith.constant 0 : index
    %9 = vector.load %arg2[%c0_2, %c0_3] : memref<16x32xf32, #tpu.memory_space<vmem>>, vector<16x32xf32>
    tpu.vector_store %arg2[%c0_2, %c0_3], %8 {strides = array<i32>} : memref<16x32xf32, #tpu.memory_space<vmem>>, vector<16x32xf32>,
    return
  }
  func.func @transform_0(%arg0: i32) -> (i32, i32) {
    %c0_i32 = arith.constant 0 : i32
    %c0_i32_0 = arith.constant 0 : i32
    return %arg0, %c0_i32 : i32, i32
  }
  func.func @transform_1(%arg0: i32) -> (i32, i32) {
    %c0_i32 = arith.constant 0 : i32
    %c0_i32_0 = arith.constant 0 : i32
    return %arg0, %c0_i32 : i32, i32
  }
}

</mosaic_0001>

<bundles_post_ra>
// kernel: tpu_custom_call.1
= control target key start
LH: loop header
LB: loop body
LE: loop exit
PB: predicated region body
PF: predicated region fallthrough
CT: control target
= control target key end

     0   :  { %6 = vsyncpa [#allocation3], 0  ;;  %s193_s0 = inlined_call_operand.hbm [shape: f32[16,64], index: 0, kind: input, shape index: {}]   ;;  %s194_s1 = inlined_call_operand.hbm [shape: f32[16,32], index: 1, kind: output, shape index: {}]  }
   0x1   :  { %7 = vsyncpa [#allocation4], 0  ;;  %s12_s8 = sshll.u32 %s193_s0, 4  ;;  %s166_s9 = smov [#allocation2]   ;;  %s13_s8 = int_to_ptr.hbm [resolvable:$true] %s12_s8 }
   0x2   :  { %s14_s10 = sshll.u32 %s166_s9, 4  ;;  %s167_s11 = smov 128   ;;  %s15_s10 = int_to_ptr.vmem [resolvable:$true] %s14_s10 }
   0x3   :  { %s168_s12 = smov 8  }
   0x4   :  { %20 = dma.hbm_to_vmem [thread:$0]  %s13_s8, 256, %s15_s10, [#allocation3], %s167_s11, %s167_s11, %s168_s12  }
   0x5   :  { %162 = dma.done.wait [#allocation3], 256  }
   0x6   :  { %163 = vsyncadd [#allocation3], 4294967040  ;;  %v25_v0 = vld [vmem:[#allocation2] sm:$0xff]  ;;  %v26_v1 = vld [vmem:[#allocation2 + $0x8] sm:$0xff]  ;;  %s169_s0 = smov 96   ;;  %vm77_vm8 = vcmask 261120  }
   0x7   :  { %v99_v2 = vmul.f32 -1.442695, %v25_v0  ;;  %v100_v3 = vmul.f32 -1.442695, %v26_v1  ;;  %s170_s13 = smov [#allocation5]   ;;  %s86_s17 = sshll.u32 %s194_s1, 4  ;;  %s87_s17 = int_to_ptr.hbm [resolvable:$true] %s86_s17 }
   0x8   :  { %s84_s14 = sshll.u32 %s170_s13, 4  ;;  %s85_s14 = int_to_ptr.vmem [resolvable:$true] %s84_s14 }
   0x9   :  { %106 = vpow2.f32 %v99_v2 }
   0xa   :  { %108 = vpow2.f32 %v100_v3 }
   0xf   :  { %v107_v4 = vpop.eup %106 }
  0x10   :  { %v109_v5 = vpop.eup %108  ;;  %v33_v6 = vadd.f32 1.0, %v107_v4 }
  0x11   :  { %v34_v7 = vadd.f32 1.0, %v109_v5 }
  0x12   :  { %110 = vrcp.f32 %v33_v6  ;;  %v46_v11 = vand.u32 2147483648, %v33_v6  ;;  %vm40_vm0 = vweird.f32 %v33_v6  ;;  %v44_v14 = vand.u32 2147483647, %v33_v6 }
  0x13   :  { %112 = vrcp.f32 %v34_v7  ;;  %vm55_vm2 = vweird.f32 %v34_v7  ;;  %v61_v19 = vand.u32 2147483648, %v34_v7  ;;  %v59_v21 = vand.u32 2147483647, %v34_v7 }
  0x14   :  { %v47_v17 = vor.u32 1.1754944e-38, %v46_v11  ;;  %vm45_vm5 = vcmp.eq.f32.partialorder %v44_v14, 8.507059e+37 }
  0x15   :  { %v62_v25 = vor.u32 1.1754944e-38, %v61_v19  ;;  %vm60_vm7 = vcmp.eq.f32.partialorder %v59_v21, 8.507059e+37 }
  0x18   :  { %v111_v8 = vpop.eup %110 }
  0x19   :  { %v113_v9 = vpop.eup %112  ;;  %v36_v10 = vmul.f32 %v111_v8, %v33_v6  ;;  %vm41_vm1 = vweird.f32 %v111_v8 }
  0x1a   :  { %v51_v12 = vmul.f32 %v113_v9, %v34_v7  ;;  %vm56_vm3 = vweird.f32 %v113_v9  ;;  %vm42_vm4 = vmor %vm40_vm0, %vm41_vm1 }
  0x1b   :  { %v37_v13 = vsub.f32 1.0, %v36_v10  ;;  %vm57_vm6 = vmor %vm55_vm2, %vm56_vm3 }
  0x1c   :  { %v52_v15 = vsub.f32 1.0, %v51_v12 }
  0x1d   :  { %v38_v16 = vmul.f32 %v111_v8, %v37_v13 }
  0x1e   :  { %v53_v18 = vmul.f32 %v113_v9, %v52_v15 }
  0x1f   :  { %v39_v20 = vadd.f32 %v111_v8, %v38_v16 }
  0x20   :  { %v54_v22 = vadd.f32 %v113_v9, %v53_v18 }
  0x21   :  { %v43_v23 = vsel %vm42_vm4, %v111_v8, %v39_v20 }
  0x22   :  { %v48_v24 = vsel %vm45_vm5, %v47_v17, %v43_v23  ;;  %v58_v27 = vsel %vm57_vm6, %v113_v9, %v54_v22 }
  0x23   :  { %v65_v26 = vmul.f32 %v48_v24, %v25_v0  ;;  %v63_v28 = vsel %vm60_vm7, %v62_v25, %v58_v27 }
  0x24   :  { %v66_v29 = vmul.f32 %v63_v28, %v26_v1 }
  0x25   :  { %69 = vrot.lane.b32.xlu0 %v65_v26, %s169_s0 }
  0x2d   :  { %71 = vrot.lane.b32.xlu0 %v66_v29, %s169_s0 }
  0x97   :  { %v70_v30 = vpop.permute.xlu0 %69 }
  0x98   :  { %v75_v31 = vmul.f32 %v70_v30, %v25_v0 }
  0x9a   :  { %78 = vst.msk [vmem:[#allocation5] sm:$0xff] %vm77_vm8, %v75_v31 }
  0x9f   :  { %v72_v32 = vpop.permute.xlu0 %71 }
  0xa0   :  { %v76_v33 = vmul.f32 %v72_v32, %v26_v1 }
  0xa2   :  { %79 = vst.msk [vmem:[#allocation5 + $0x8] sm:$0xff] %vm77_vm8, %v76_v33 }
  0xa3   :  { %92 = dma.vmem_to_hbm [thread:$0]  %s85_s14, 256, %s87_s17, [#allocation4], %s167_s11, %s167_s11, %s168_s12  }
  0xa4   :  { %164 = dma.done.wait [#allocation4], 256  }
  0xa5   :  { %165 = vsyncadd [#allocation4], 4294967040 }
  0xa6   :  { %97 = vsyncpa [#allocation3], 1 }
  0xa7   :  { %98 = vsyncpa [#allocation4], 1 }

</bundles_post_ra>
